<compile_context>
chip_gen: v7x
topology: tpu7x:2x2x1
jax: 0.10.0
libtpu: 0.0.40
codegen_flags: <defaults>
</compile_context>

<pallas_src>
import functools

import jax
import jax.numpy as jnp
from jax.experimental import pallas as pl
from jax.experimental.pallas import tpu as pltpu

_LANE = 128


def _linear_relu_kernel(x_ref, w_ref, b_ref, o_ref):
    # x_ref: (TILE_ROWS, LW) VMEM  -- LW = fold*H lanes, `fold` batch rows per sublane row
    # w_ref: (LW, fold)     VMEM  -- block-diagonal weight (column c = w at rows c*H:(c+1)*H)
    # b_ref: (1, 1)         SMEM  -- scalar bias
    # o_ref: (TILE_ROWS, fold) VMEM
    y = jnp.dot(x_ref[...], w_ref[...], preferred_element_type=jnp.float32)  # MXU
    y = jnp.maximum(y + b_ref[0, 0], 0.0)                                    # bias + ReLU (VPU)
    o_ref[...] = y.astype(o_ref.dtype)


@functools.partial(jax.jit, static_argnames=("tile_rows",))
def basenet_forward(x, weight, bias, *, tile_rows=4096):
    """relu(x @ weight.T + bias).

    x:      (B, H) float32
    weight: (1, H) float32  (PyTorch nn.Linear(h_hidden, 1) layout)
    bias:   (1,)   float32
    returns (B, 1) float32
    """
    x = jax.lax.stop_gradient(x)          # mirrors x.detach() in the PyTorch forward
    B, H = x.shape

    # Fold H into the lane dimension when it divides 128 (fold = 4 for H = 32).
    fold = _LANE // H if (H <= _LANE and _LANE % H == 0) else 1
    b_pad = pl.cdiv(B, fold) * fold
    if b_pad != B:
        # Only a <fold-row pad, and only when B is not a multiple of `fold`.
        x = jnp.pad(x, ((0, b_pad - B), (0, 0)))
    lw = fold * H
    rows = b_pad // fold
    x_folded = x.reshape(rows, lw)        # free contiguous row-major reshape

    # Block-diagonal selection weight (lw, fold): column c holds w in rows c*H:(c+1)*H.
    w_sel = jnp.kron(jnp.eye(fold, dtype=x.dtype), weight.reshape(H, 1).astype(x.dtype))
    b2 = bias.reshape(1, 1).astype(jnp.float32)   # scalar bias -> SMEM

    # Tile selection: big tiles to amortize per-grid-step overhead, but keep
    # >= 2 balanced parallel tiles when the batch allows it (v7x megacore), and
    # keep the double-buffered x footprint small (4096 x 128 x 4B = 2 MiB/buffer,
    # well under v5e's 16 MiB / v7x's 32 MiB scoped-VMEM defaults).
    tile_rows = max(8, (tile_rows // 8) * 8)
    if rows > 8:
        half = ((pl.cdiv(rows, 2) + 7) // 8) * 8
        tile_rows = min(tile_rows, half)
    n_tiles = pl.cdiv(rows, tile_rows)

    out = pl.pallas_call(
        _linear_relu_kernel,
        out_shape=jax.ShapeDtypeStruct((rows, fold), x.dtype),
        grid=(n_tiles,),
        in_specs=[
            pl.BlockSpec((tile_rows, lw), lambda i: (i, 0)),          # x tile (pipelined)
            pl.BlockSpec((lw, fold), lambda i: (0, 0)),               # weight (resident)
            pl.BlockSpec(memory_space=pltpu.MemorySpace.SMEM),        # bias scalar
        ],
        out_specs=pl.BlockSpec((tile_rows, fold), lambda i: (i, 0)),
        compiler_params=pltpu.CompilerParams(
            dimension_semantics=("parallel",),   # independent batch tiles (v7x: both TCs)
        ),
    )(x_folded, w_sel, b2)

    # (rows, fold) row-major is exactly (b_pad, 1) in original batch order.
    return out.reshape(b_pad, 1)[:B]


# TODO(synk): for tiny batches this standalone pallas_call is launch-overhead
# dominated; in a real model this op should be fused into the surrounding kernel.


if __name__ == "__main__":
    key = jax.random.PRNGKey(0)
    kx, kw, kb = jax.random.split(key, 3)

    batch = 2000        # not a multiple of the tile -> exercises the ragged last block
    h_hidden = 32

    # Deterministic parameters (mimic nn.Linear(h_hidden, 1) shapes).
    bound = 1.0 / jnp.sqrt(h_hidden)
    weight = jax.random.uniform(kw, (1, h_hidden), jnp.float32, -bound, bound)
    bias = jax.random.uniform(kb, (1,), jnp.float32, -bound, bound)

    x = jax.random.normal(kx, (batch, h_hidden), jnp.float32)

    out = basenet_forward(x, weight, bias)
    out = jax.block_until_ready(out)

    # Reference check (plain JAX).
    ref = jnp.maximum(x @ weight.T + bias, 0.0)
    assert out.shape == (batch, 1)
    assert jnp.allclose(out, ref, atol=1e-5, rtol=1e-5)

    print("KERNEL_OK")
</pallas_src>

<mosaic_0001>
module attributes {stable_mosaic.version = 11 : i64} {
  func.func @_linear_relu_kernel(%arg0: i32, %arg1: memref<256x128xf32, #tpu.memory_space<vmem>>, %arg2: memref<128x4xf32, #tpu.memory_space<vmem>>, %arg3: memref<1x1xf32, #tpu.memory_space<smem>>, %arg4: memref<256x4xf32, #tpu.memory_space<vmem>>) attributes {dimension_semantics = [#tpu.dimension_semantics<parallel>], iteration_bounds = array<i64: 2>, scalar_prefetch = 0 : i64, scratch_operands = 0 : i64, tpu.core_type = #tpu.core_type<tc>, window_params = [{transform_indices = @transform_0, window_bounds = array<i64: 256, 128>}, {pipeline_mode = #tpu.pipeline_mode<synchronous>, transform_indices = @transform_1, window_bounds = array<i64: 128, 4>}, {transform_indices = @transform_2, window_bounds = array<i64: 1, 1>}, {transform_indices = @transform_3, window_bounds = array<i64: 256, 4>}]} {
    %c0 = arith.constant 0 : index
    %c0_0 = arith.constant 0 : index
    %0 = vector.load %arg1[%c0, %c0_0] : memref<256x128xf32, #tpu.memory_space<vmem>>, vector<256x128xf32>
    %c0_1 = arith.constant 0 : index
    %c0_2 = arith.constant 0 : index
    %1 = vector.load %arg2[%c0_1, %c0_2] : memref<128x4xf32, #tpu.memory_space<vmem>>, vector<128x4xf32>
    %cst = arith.constant dense<0.000000e+00> : vector<256x4xf32>
    %2 = tpu.matmul %0, %1, %cst {dimension_numbers = #tpu.dot_dimension_numbers<[1], [0], [0], [1], [0, 0, 1, 1], [], []>} : vector<256x128xf32>, vector<128x4xf32>, vector<256x4xf32> -> vector<256x4xf32>
    %c0_3 = arith.constant 0 : index
    %c0_4 = arith.constant 0 : index
    %3 = memref.load %arg3[%c0_3, %c0_4] : memref<1x1xf32, #tpu.memory_space<smem>>
    %4 = vector.broadcast %3 : f32 to vector<256x4xf32>
    %5 = arith.addf %2, %4 : vector<256x4xf32>
    %cst_5 = arith.constant 0.000000e+00 : f32
    %6 = vector.broadcast %cst_5 : f32 to vector<256x4xf32>
    %7 = arith.maximumf %5, %6 : vector<256x4xf32>
    %c0_6 = arith.constant 0 : index
    %c0_7 = arith.constant 0 : index
    %8 = vector.load %arg4[%c0_6, %c0_7] : memref<256x4xf32, #tpu.memory_space<vmem>>, vector<256x4xf32>
    tpu.vector_store %arg4[%c0_6, %c0_7], %7 {strides = array<i32>} : memref<256x4xf32, #tpu.memory_space<vmem>>, vector<256x4xf32>,
    return
  }
  func.func @transform_0(%arg0: i32) -> (i32, i32) {
    %c0_i32 = arith.constant 0 : i32
    %c0_i32_0 = arith.constant 0 : i32
    return %arg0, %c0_i32 : i32, i32
  }
  func.func @transform_1(%arg0: i32) -> (i32, i32) {
    %c0_i32 = arith.constant 0 : i32
    %c0_i32_0 = arith.constant 0 : i32
    %c0_i32_1 = arith.constant 0 : i32
    return %c0_i32, %c0_i32_0 : i32, i32
  }
  func.func @transform_2(%arg0: i32) -> (i32, i32) {
    %c0_i32 = arith.constant 0 : i32
    %c0_i32_0 = arith.constant 0 : i32
    %c0_i32_1 = arith.constant 0 : i32
    return %c0_i32, %c0_i32_0 : i32, i32
  }
  func.func @transform_3(%arg0: i32) -> (i32, i32) {
    %c0_i32 = arith.constant 0 : i32
    %c0_i32_0 = arith.constant 0 : i32
    return %arg0, %c0_i32 : i32, i32
  }
}

</mosaic_0001>

<bundles_post_ra>
// kernel: basenet_forward.1
= control target key start
LH: loop header
LB: loop body
LE: loop exit
PB: predicated region body
PF: predicated region fallthrough
CT: control target
= control target key end

     0   :  { %s1633_s0 = inlined_call_operand.vmem [shape: f32[500,128], index: 0, kind: input, shape index: {}]   ;;  %s1634_s1 = inlined_call_operand.vmem [shape: f32[128,4], index: 1, kind: input, shape index: {}]   ;;  %s1635_s2 = inlined_call_operand.<no memory space> [shape: f32[1,1], index: 2, kind: input, shape index: {}]   ;;  %s1636_s3 = inlined_call_operand.vmem [shape: f32[500,4], index: 3, kind: output, shape index: {}]  }
   0x1   :  { %8 = sst [smem:[#allocation2]] %s1635_s2 }
   0x2   :  { %s1274_s14 = smov 0   ;;  %s1276_s15 = smov 0  }
   0x3   :  { %s1278_s16 = smov 0  }
   0x4 LB: > { %s1287_s2 = sadd.s32 4294967295, %s1217_s16   ;;  %s1289_s17 = sadd.s32 1, %s1217_s16   ;;  %s1217_s16 = sphi %s1278_s16, %s1645_s16   ;;  %s1213_s15 = sphi %s1276_s15, %s1644_s15   ;;  %s1209_s14 = sphi %s1274_s14, %s1643_s14  }
   0x5   : > { %s86_s18 = ssub.s32 %s1217_s16, %s1289_s17  ;;  %s89_s19 = sadd.s32 1, %s1213_s15 }
   0x6   : > { %p87_p0 = scmp.eq.s32.totalorder %s86_s18, 0  ;;  %p99_p1 = scmp.ne.s32.totalorder %s1213_s15, %s1209_s14 }
   0x7   : > { %p100_p2 = scmp.eq.s32.totalorder %s1287_s2, 1  ;;  %p875_p3 = scmp.ge.s32.totalorder %s1217_s16, 1 }
   0x8   : > { %s1297_s20 = scalar_select %p87_p0, %s1213_s15, %s89_s19  }
   0x9   : > { %p1299_p4 = por %p100_p2, %p99_p1  ;;  %p147_p5 = scmp.lt.s32.totalorder %s1217_s16, 3 }
   0xb   : > { %p148_p6 = pnand %p875_p3, %p147_p5 }
   0xc   : > { %v225_v0 = vld [vmem:[%s1634_s1] sm:$0xff] (!%p148_p6)  ;;  %v226_v1 = vld [vmem:[%s1634_s1 + $0x8] sm:$0xff] (!%p148_p6)  ;;  %v227_v2 = vld [vmem:[%s1634_s1 + $0x10] sm:$0xff] (!%p148_p6)  ;;  %s1313_s28 = sshll.u32 (!%p148_p6), %s1287_s2, 5  ;;  %s241_s12 = sld [smem:[#allocation2]] (!%p148_p6)  ;;  %vm500_vm0 = vcmask (!%p148_p6), 31744  }
   0xd   : > { %151 = sbr.rel (%p148_p6) target bundleno = 349 (0x15d), region = 32  ;;  %v1027_v3 = vpack.c.bf16 (!%p148_p6), %v226_v1, %v225_v0  ;;  %v228_v4 = vld [vmem:[%s1634_s1 + $0x18] sm:$0xff] (!%p148_p6)  ;;  %p179_p7 = scmp.lt.s32.totalorder (!%p148_p6), %s1313_s28, 62  ;;  %v229_v6 = vld [vmem:[%s1634_s1 + $0x20] sm:$0xff] (!%p148_p6)  ;;  %v230_v7 = vld [vmem:[%s1634_s1 + $0x28] sm:$0xff] (!%p148_p6) }
   0xe   : > { %v1031_v5 = vpack.c.bf16 (!%p148_p6), %v228_v4, %v227_v2  ;;  %v1035_v8 = vpack.c.bf16 (!%p148_p6), %v230_v7, %v229_v6  ;;  %v231_v9 = vld [vmem:[%s1634_s1 + $0x30] sm:$0xff] (!%p148_p6)  ;;  %v232_v10 = vld [vmem:[%s1634_s1 + $0x38] sm:$0xff] (!%p148_p6)  ;;  %v233_v14 = vld [vmem:[%s1634_s1 + $0x40] sm:$0xff] (!%p148_p6)  ;;  %s171_s13 = sand.u32 (!%p148_p6), 1, %s1209_s14  }
   0xf   : > { %1028 = vmatprep.subr.bf16.mxu0 (!%p148_p6), %v1027_v3  ;;  %1059 = vmatprep.subr.bf16.mxu1 (!%p148_p6), %v1027_v3  ;;  %v1039_v13 = vpack.c.bf16 (!%p148_p6), %v232_v10, %v231_v9  ;;  %v234_v15 = vld [vmem:[%s1634_s1 + $0x48] sm:$0xff] (!%p148_p6)  ;;  %v235_v17 = vld [vmem:[%s1634_s1 + $0x50] sm:$0xff] (!%p148_p6)  ;;  %v236_v18 = vld [vmem:[%s1634_s1 + $0x58] sm:$0xff] (!%p148_p6)  ;;  %s876_s16 = sshll.u32 (!%p148_p6), %s171_s13, 8 }
  0x10   : > { %1030 = vmatpush3.bf16.msra.mxu0 (!%p148_p6), %v1027_v3  ;;  %1067 = vmatpush3.bf16.msra.mxu1 (!%p148_p6), %v1027_v3  ;;  %v1043_v16 = vpack.c.bf16 (!%p148_p6), %v234_v15, %v233_v14  ;;  %v1047_v19 = vpack.c.bf16 (!%p148_p6), %v236_v18, %v235_v17  ;;  %v237_v20 = vld [vmem:[%s1634_s1 + $0x60] sm:$0xff] (!%p148_p6)  ;;  %v238_v21 = vld [vmem:[%s1634_s1 + $0x68] sm:$0xff] (!%p148_p6)  ;;  %v239_v23 = vld [vmem:[%s1634_s1 + $0x70] sm:$0xff] (!%p148_p6)  ;;  %s1400_s14 = scalar_lea.vmem (!%p148_p6), [#allocation3], %s876_s16  }
  0x11   : > { %1032 = vmatprep.subr.bf16.mxu0 (!%p148_p6), %v1031_v5  ;;  %1060 = vmatprep.subr.bf16.mxu1 (!%p148_p6), %v1031_v5  ;;  %v1051_v22 = vpack.c.bf16 (!%p148_p6), %v238_v21, %v237_v20  ;;  %v240_v24 = vld [vmem:[%s1634_s1 + $0x78] sm:$0xff] (!%p148_p6) }
  0x12   : > { %v1055_v25 = vpack.c.bf16 (!%p148_p6), %v240_v24, %v239_v23  ;;  %v1394_v56 = vstv (!%p148_p6), %s241_s12 }
  0x14   : > { %s180_s8 = scalar_select %p179_p7, %s1313_s28, 62  ;;  %1034 = vmatpush3.bf16.msra.mxu0 %v1031_v5  ;;  %1068 = vmatpush3.bf16.msra.mxu1 %v1031_v5 }
  0x15   : > { %1036 = vmatprep.subr.bf16.mxu0 %v1035_v8  ;;  %1061 = vmatprep.subr.bf16.mxu1 %v1035_v8  ;;  %s541_s18 = ssub.s32 (%p1299_p4), 63, %s1313_s28 }
  0x16   : > { %s878_s9 = sshll.u32 %s180_s8, 3  ;;  %p542_p8 = scmp.lt.s32.totalorder (%p1299_p4), %s541_s18, 32 }
  0x17   : > { %s1335_s19 = scalar_lea.vmem %s1633_s0, %s878_s9 }
  0x18   : > { %v193_v11 = vld [vmem:[%s1335_s19] sm:$0xff]  ;;  %1038 = vmatpush3.bf16.msra.mxu0 %v1035_v8  ;;  %1069 = vmatpush3.bf16.msra.mxu1 %v1035_v8  ;;  %v194_v26 = vld [vmem:[%s1335_s19 + $0x8] sm:$0xff]  ;;  %v195_v28 = vld [vmem:[%s1335_s19 + $0x10] sm:$0xff] }
  0x19   : > { %v209_v12 = vld [vmem:[%s1335_s19 + $0x80] sm:$0xff]  ;;  %979 = vmatprep.mubr.f32.mxu0 %v193_v11  ;;  %1040 = vmatprep.subr.bf16.mxu0 %v1039_v13  ;;  %v210_v27 = vld [vmem:[%s1335_s19 + $0x88] sm:$0xff]  ;;  %v211_v29 = vld [vmem:[%s1335_s19 + $0x90] sm:$0xff] }
  0x1a   : > { %1003 = vmatprep.mubr.f32.mxu1 %v209_v12  ;;  %1062 = vmatprep.subr.bf16.mxu1 %v1039_v13  ;;  %v196_v30 = vld [vmem:[%s1335_s19 + $0x18] sm:$0xff]  ;;  %v197_v32 = vld [vmem:[%s1335_s19 + $0x20] sm:$0xff]  ;;  %v198_v34 = vld [vmem:[%s1335_s19 + $0x28] sm:$0xff] }
  0x1b   : > { %v212_v31 = vld [vmem:[%s1335_s19 + $0x98] sm:$0xff]  ;;  %v213_v33 = vld [vmem:[%s1335_s19 + $0xa0] sm:$0xff]  ;;  %v214_v35 = vld [vmem:[%s1335_s19 + $0xa8] sm:$0xff] }
  0x1c   : > { %1042 = vmatpush3.bf16.msra.mxu0 %v1039_v13  ;;  %1070 = vmatpush3.bf16.msra.mxu1 %v1039_v13  ;;  %v199_v36 = vld [vmem:[%s1335_s19 + $0x30] sm:$0xff]  ;;  %v200_v38 = vld [vmem:[%s1335_s19 + $0x38] sm:$0xff]  ;;  %v201_v40 = vld [vmem:[%s1335_s19 + $0x40] sm:$0xff] }
  0x1d   : > { %1044 = vmatprep.subr.bf16.mxu0 %v1043_v16  ;;  %1063 = vmatprep.subr.bf16.mxu1 %v1043_v16  ;;  %v215_v37 = vld [vmem:[%s1335_s19 + $0xb0] sm:$0xff]  ;;  %v216_v39 = vld [vmem:[%s1335_s19 + $0xb8] sm:$0xff]  ;;  %v217_v41 = vld [vmem:[%s1335_s19 + $0xc0] sm:$0xff] }
  0x1e   : > { %v202_v42 = vld [vmem:[%s1335_s19 + $0x48] sm:$0xff]  ;;  %v203_v44 = vld [vmem:[%s1335_s19 + $0x50] sm:$0xff]  ;;  %v204_v46 = vld [vmem:[%s1335_s19 + $0x58] sm:$0xff] }
  0x1f   : > { %v218_v43 = vld [vmem:[%s1335_s19 + $0xc8] sm:$0xff]  ;;  %v219_v45 = vld [vmem:[%s1335_s19 + $0xd0] sm:$0xff]  ;;  %v220_v47 = vld [vmem:[%s1335_s19 + $0xd8] sm:$0xff] }
  0x20   : > { %1046 = vmatpush3.bf16.msra.mxu0 %v1043_v16  ;;  %1071 = vmatpush3.bf16.msra.mxu1 %v1043_v16  ;;  %v205_v48 = vld [vmem:[%s1335_s19 + $0x60] sm:$0xff]  ;;  %v206_v50 = vld [vmem:[%s1335_s19 + $0x68] sm:$0xff]  ;;  %v207_v52 = vld [vmem:[%s1335_s19 + $0x70] sm:$0xff] }
  0x21   : > { %1048 = vmatprep.subr.bf16.mxu0 %v1047_v19  ;;  %1064 = vmatprep.subr.bf16.mxu1 %v1047_v19  ;;  %v221_v49 = vld [vmem:[%s1335_s19 + $0xe0] sm:$0xff]  ;;  %v222_v51 = vld [vmem:[%s1335_s19 + $0xe8] sm:$0xff]  ;;  %v223_v53 = vld [vmem:[%s1335_s19 + $0xf0] sm:$0xff] }
  0x22   : > { %v208_v54 = vld [vmem:[%s1335_s19 + $0x78] sm:$0xff] }
  0x23   : > { %v224_v55 = vld [vmem:[%s1335_s19 + $0xf8] sm:$0xff]  ;;  %s896_s19 = sshll.u32 (%p1299_p4), %s1287_s2, 8 }
  0x24   : > { %1050 = vmatpush3.bf16.msra.mxu0 %v1047_v19  ;;  %1072 = vmatpush3.bf16.msra.mxu1 %v1047_v19  ;;  %s1501_s24 = scalar_lea.vmem (%p1299_p4), %s1636_s3, %s896_s19  }
  0x25   : > { %1052 = vmatprep.subr.bf16.mxu0 %v1051_v22  ;;  %1065 = vmatprep.subr.bf16.mxu1 %v1051_v22 }
  0x28   : > { %1054 = vmatpush3.bf16.msra.mxu0 %v1051_v22  ;;  %1073 = vmatpush3.bf16.msra.mxu1 %v1051_v22 }
  0x29   : > { %1056 = vmatprep.subr.bf16.mxu0 %v1055_v25  ;;  %1066 = vmatprep.subr.bf16.mxu1 %v1055_v25 }
  0x2c   : > { %1058 = vmatpush3.bf16.msra.mxu0 %v1055_v25  ;;  %1074 = vmatpush3.bf16.msra.mxu1 %v1055_v25 }
  0x2f   : > { %980 = vmatmul.mubr.f32.vlgmr.msra.gmra.mrb[0].mxu0 %v194_v26  ;;  %1004 = vmatmul.mubr.f32.vlgmr.msra.gmra.mrb[0].mxu1 %v210_v27 }
  0x30   : > { %982 = vmatprep.mubr.f32.mxu0 %v195_v28  ;;  %1006 = vmatprep.mubr.f32.mxu1 %v211_v29 }
  0x33   : > { %983 = vmatmul.mubr.f32.gmra.mrb[2].mxu0 %v196_v30  ;;  %1007 = vmatmul.mubr.f32.gmra.mrb[2].mxu1 %v212_v31 }
  0x34   : > { %985 = vmatprep.mubr.f32.mxu0 %v197_v32  ;;  %1009 = vmatprep.mubr.f32.mxu1 %v213_v33 }
  0x37   : > { %986 = vmatmul.mubr.f32.gmra.mrb[4].mxu0 %v198_v34  ;;  %1010 = vmatmul.mubr.f32.gmra.mrb[4].mxu1 %v214_v35 }
  0x38   : > { %988 = vmatprep.mubr.f32.mxu0 %v199_v36  ;;  %1012 = vmatprep.mubr.f32.mxu1 %v215_v37 }
  0x3b   : > { %989 = vmatmul.mubr.f32.gmra.mrb[6].mxu0 %v200_v38  ;;  %1013 = vmatmul.mubr.f32.gmra.mrb[6].mxu1 %v216_v39 }
  0x3c   : > { %991 = vmatprep.mubr.f32.mxu0 %v201_v40  ;;  %1015 = vmatprep.mubr.f32.mxu1 %v217_v41 }
  0x3f   : > { %992 = vmatmul.mubr.f32.gmra.mrb[8].mxu0 %v202_v42  ;;  %1016 = vmatmul.mubr.f32.gmra.mrb[8].mxu1 %v218_v43 }
  0x40   : > { %994 = vmatprep.mubr.f32.mxu0 %v203_v44  ;;  %1018 = vmatprep.mubr.f32.mxu1 %v219_v45 }
  0x43   : > { %995 = vmatmul.mubr.f32.gmra.mrb[10].mxu0 %v204_v46  ;;  %1019 = vmatmul.mubr.f32.gmra.mrb[10].mxu1 %v220_v47 }
  0x44   : > { %997 = vmatprep.mubr.f32.mxu0 %v205_v48  ;;  %1021 = vmatprep.mubr.f32.mxu1 %v221_v49 }
  0x47   : > { %998 = vmatmul.mubr.f32.gmra.mrb[12].mxu0 %v206_v50  ;;  %1022 = vmatmul.mubr.f32.gmra.mrb[12].mxu1 %v222_v51 }
  0x48   : > { %1000 = vmatprep.mubr.f32.mxu0 %v207_v52  ;;  %1024 = vmatprep.mubr.f32.mxu1 %v223_v53 }
  0x4b   : > { %1001 = vmatmul.mubr.f32.gmra.mrb[14].mxu0 %v208_v54  ;;  %1025 = vmatmul.mubr.f32.gmra.mrb[14].mxu1 %v224_v55 }
 0x102   : > { %v981_v57 = vpop.f32.mrb[0].mxu0  ;;  %v1005_v58 = vpop.f32.mrb[0].mxu1 }
 0x103   : > { %v315_v59 = vadd.f32 %v981_v57, %v1394_v56  ;;  %v395_v60 = vadd.f32 %v1005_v58, %v1394_v56  ;;  %v309_v61 = vpop.f32.mrb[1].mxu0  ;;  %v389_v62 = vpop.f32.mrb[1].mxu1 }
 0x104   : > { %v310_v63 = vadd.f32 %v309_v61, %v1394_v56  ;;  %v390_v0 = vadd.f32 %v389_v62, %v1394_v56 }
 0x105   : > { %v469_v1 = vmax.f32 %v315_v59, 0.0  ;;  %v485_v2 = vmax.f32 %v395_v60, 0.0 }
 0x106   : > { %v468_v3 = vmax.f32 %v310_v63, 0.0  ;;  %v484_v4 = vmax.f32 %v390_v0, 0.0  ;;  %v984_v5 = vpop.f32.mrb[2].mxu0  ;;  %v1008_v6 = vpop.f32.mrb[2].mxu1 }
 0x107   : > { %502 = vst.msk [vmem:[%s1400_s14 + $0x8] sm:$0xff] %vm500_vm0, %v469_v1  ;;  %518 = vst.msk [vmem:[%s1400_s14 + $0x88] sm:$0xff] %vm500_vm0, %v485_v2  ;;  %v325_v7 = vadd.f32 %v984_v5, %v1394_v56  ;;  %v405_v8 = vadd.f32 %v1008_v6, %v1394_v56  ;;  %v319_v9 = vpop.f32.mrb[3].mxu0  ;;  %v399_v10 = vpop.f32.mrb[3].mxu1 }
 0x108   : > { %501 = vst.msk [vmem:[%s1400_s14] sm:$0xff] %vm500_vm0, %v468_v3  ;;  %517 = vst.msk [vmem:[%s1400_s14 + $0x80] sm:$0xff] %vm500_vm0, %v484_v4  ;;  %v320_v11 = vadd.f32 %v319_v9, %v1394_v56  ;;  %v400_v12 = vadd.f32 %v399_v10, %v1394_v56 }
 0x109   : > { %v471_v13 = vmax.f32 %v325_v7, 0.0  ;;  %v487_v14 = vmax.f32 %v405_v8, 0.0 }
 0x10a   : > { %v470_v15 = vmax.f32 %v320_v11, 0.0  ;;  %v486_v16 = vmax.f32 %v400_v12, 0.0  ;;  %v987_v17 = vpop.f32.mrb[4].mxu0  ;;  %v1011_v18 = vpop.f32.mrb[4].mxu1 }
 0x10b   : > { %504 = vst.msk [vmem:[%s1400_s14 + $0x18] sm:$0xff] %vm500_vm0, %v471_v13  ;;  %520 = vst.msk [vmem:[%s1400_s14 + $0x98] sm:$0xff] %vm500_vm0, %v487_v14  ;;  %v335_v19 = vadd.f32 %v987_v17, %v1394_v56  ;;  %v415_v20 = vadd.f32 %v1011_v18, %v1394_v56  ;;  %v329_v21 = vpop.f32.mrb[5].mxu0  ;;  %v409_v22 = vpop.f32.mrb[5].mxu1 }
 0x10c   : > { %503 = vst.msk [vmem:[%s1400_s14 + $0x10] sm:$0xff] %vm500_vm0, %v470_v15  ;;  %519 = vst.msk [vmem:[%s1400_s14 + $0x90] sm:$0xff] %vm500_vm0, %v486_v16  ;;  %v330_v23 = vadd.f32 %v329_v21, %v1394_v56  ;;  %v410_v24 = vadd.f32 %v409_v22, %v1394_v56 }
 0x10d   : > { %v473_v25 = vmax.f32 %v335_v19, 0.0  ;;  %v489_v26 = vmax.f32 %v415_v20, 0.0 }
 0x10e   : > { %v472_v27 = vmax.f32 %v330_v23, 0.0  ;;  %v488_v28 = vmax.f32 %v410_v24, 0.0  ;;  %v990_v29 = vpop.f32.mrb[6].mxu0  ;;  %v1014_v30 = vpop.f32.mrb[6].mxu1 }
 0x10f   : > { %506 = vst.msk [vmem:[%s1400_s14 + $0x28] sm:$0xff] %vm500_vm0, %v473_v25  ;;  %522 = vst.msk [vmem:[%s1400_s14 + $0xa8] sm:$0xff] %vm500_vm0, %v489_v26  ;;  %v345_v31 = vadd.f32 %v990_v29, %v1394_v56  ;;  %v425_v32 = vadd.f32 %v1014_v30, %v1394_v56  ;;  %v339_v33 = vpop.f32.mrb[7].mxu0  ;;  %v419_v34 = vpop.f32.mrb[7].mxu1 }
 0x110   : > { %505 = vst.msk [vmem:[%s1400_s14 + $0x20] sm:$0xff] %vm500_vm0, %v472_v27  ;;  %521 = vst.msk [vmem:[%s1400_s14 + $0xa0] sm:$0xff] %vm500_vm0, %v488_v28  ;;  %v340_v35 = vadd.f32 %v339_v33, %v1394_v56  ;;  %v420_v36 = vadd.f32 %v419_v34, %v1394_v56 }
 0x111   : > { %v475_v37 = vmax.f32 %v345_v31, 0.0  ;;  %v491_v38 = vmax.f32 %v425_v32, 0.0 }
 0x112   : > { %v474_v39 = vmax.f32 %v340_v35, 0.0  ;;  %v490_v40 = vmax.f32 %v420_v36, 0.0  ;;  %v993_v41 = vpop.f32.mrb[8].mxu0  ;;  %v1017_v42 = vpop.f32.mrb[8].mxu1 }
 0x113   : > { %508 = vst.msk [vmem:[%s1400_s14 + $0x38] sm:$0xff] %vm500_vm0, %v475_v37  ;;  %524 = vst.msk [vmem:[%s1400_s14 + $0xb8] sm:$0xff] %vm500_vm0, %v491_v38  ;;  %v355_v43 = vadd.f32 %v993_v41, %v1394_v56  ;;  %v435_v44 = vadd.f32 %v1017_v42, %v1394_v56  ;;  %v349_v45 = vpop.f32.mrb[9].mxu0  ;;  %v429_v46 = vpop.f32.mrb[9].mxu1 }
 0x114   : > { %507 = vst.msk [vmem:[%s1400_s14 + $0x30] sm:$0xff] %vm500_vm0, %v474_v39  ;;  %523 = vst.msk [vmem:[%s1400_s14 + $0xb0] sm:$0xff] %vm500_vm0, %v490_v40  ;;  %v350_v47 = vadd.f32 %v349_v45, %v1394_v56  ;;  %v430_v48 = vadd.f32 %v429_v46, %v1394_v56 }
 0x115   : > { %v477_v49 = vmax.f32 %v355_v43, 0.0  ;;  %v493_v50 = vmax.f32 %v435_v44, 0.0 }
 0x116   : > { %v476_v51 = vmax.f32 %v350_v47, 0.0  ;;  %v492_v52 = vmax.f32 %v430_v48, 0.0  ;;  %v996_v53 = vpop.f32.mrb[10].mxu0  ;;  %v1020_v54 = vpop.f32.mrb[10].mxu1 }
 0x117   : > { %510 = vst.msk [vmem:[%s1400_s14 + $0x48] sm:$0xff] %vm500_vm0, %v477_v49  ;;  %526 = vst.msk [vmem:[%s1400_s14 + $0xc8] sm:$0xff] %vm500_vm0, %v493_v50  ;;  %v365_v55 = vadd.f32 %v996_v53, %v1394_v56  ;;  %v445_v57 = vadd.f32 %v1020_v54, %v1394_v56  ;;  %v359_v58 = vpop.f32.mrb[11].mxu0  ;;  %v439_v59 = vpop.f32.mrb[11].mxu1 }
 0x118   : > { %509 = vst.msk [vmem:[%s1400_s14 + $0x40] sm:$0xff] %vm500_vm0, %v476_v51  ;;  %525 = vst.msk [vmem:[%s1400_s14 + $0xc0] sm:$0xff] %vm500_vm0, %v492_v52  ;;  %v360_v60 = vadd.f32 %v359_v58, %v1394_v56  ;;  %v440_v61 = vadd.f32 %v439_v59, %v1394_v56 }
 0x119   : > { %v479_v62 = vmax.f32 %v365_v55, 0.0  ;;  %v495_v63 = vmax.f32 %v445_v57, 0.0 }
 0x11a   : > { %v478_v0 = vmax.f32 %v360_v60, 0.0  ;;  %v494_v1 = vmax.f32 %v440_v61, 0.0  ;;  %v999_v2 = vpop.f32.mrb[12].mxu0  ;;  %v1023_v3 = vpop.f32.mrb[12].mxu1 }
 0x11b   : > { %512 = vst.msk [vmem:[%s1400_s14 + $0x58] sm:$0xff] %vm500_vm0, %v479_v62  ;;  %528 = vst.msk [vmem:[%s1400_s14 + $0xd8] sm:$0xff] %vm500_vm0, %v495_v63  ;;  %v375_v4 = vadd.f32 %v999_v2, %v1394_v56  ;;  %v455_v5 = vadd.f32 %v1023_v3, %v1394_v56  ;;  %v369_v6 = vpop.f32.mrb[13].mxu0  ;;  %v449_v7 = vpop.f32.mrb[13].mxu1 }
 0x11c   : > { %511 = vst.msk [vmem:[%s1400_s14 + $0x50] sm:$0xff] %vm500_vm0, %v478_v0  ;;  %527 = vst.msk [vmem:[%s1400_s14 + $0xd0] sm:$0xff] %vm500_vm0, %v494_v1  ;;  %v370_v8 = vadd.f32 %v369_v6, %v1394_v56  ;;  %v450_v9 = vadd.f32 %v449_v7, %v1394_v56 }
 0x11d   : > { %v481_v10 = vmax.f32 %v375_v4, 0.0  ;;  %v497_v11 = vmax.f32 %v455_v5, 0.0 }
 0x11e   : > { %v480_v12 = vmax.f32 %v370_v8, 0.0  ;;  %v496_v13 = vmax.f32 %v450_v9, 0.0  ;;  %v1002_v14 = vpop.f32.mrb[14].mxu0  ;;  %v1026_v15 = vpop.f32.mrb[14].mxu1  ;;  %539 = sbr.rel (!%p1299_p4) target bundleno = 349 (0x15d), region = 36 }
 0x11f   : > { %514 = vst.msk [vmem:[%s1400_s14 + $0x68] sm:$0xff] %vm500_vm0, %v481_v10  ;;  %530 = vst.msk [vmem:[%s1400_s14 + $0xe8] sm:$0xff] %vm500_vm0, %v497_v11  ;;  %v385_v16 = vadd.f32 %v1002_v14, %v1394_v56  ;;  %v465_v17 = vadd.f32 %v1026_v15, %v1394_v56  ;;  %v379_v18 = vpop.f32.mrb[15].mxu0  ;;  %v459_v19 = vpop.f32.mrb[15].mxu1 }
 0x120   : > { %513 = vst.msk [vmem:[%s1400_s14 + $0x60] sm:$0xff] %vm500_vm0, %v480_v12  ;;  %529 = vst.msk [vmem:[%s1400_s14 + $0xe0] sm:$0xff] %vm500_vm0, %v496_v13  ;;  %v380_v20 = vadd.f32 %v379_v18, %v1394_v56  ;;  %v460_v21 = vadd.f32 %v459_v19, %v1394_v56 }
 0x121   : > { %v483_v22 = vmax.f32 %v385_v16, 0.0  ;;  %v499_v23 = vmax.f32 %v465_v17, 0.0 }
 0x122   : > { %v482_v24 = vmax.f32 %v380_v20, 0.0  ;;  %v498_v25 = vmax.f32 %v460_v21, 0.0 }
 0x123   : > { %516 = vst.msk [vmem:[%s1400_s14 + $0x78] sm:$0xff] %vm500_vm0, %v483_v22  ;;  %532 = vst.msk [vmem:[%s1400_s14 + $0xf8] sm:$0xff] %vm500_vm0, %v499_v23 }
 0x124   : > { %515 = vst.msk [vmem:[%s1400_s14 + $0x70] sm:$0xff] %vm500_vm0, %v482_v24  ;;  %531 = vst.msk [vmem:[%s1400_s14 + $0xf0] sm:$0xff] %vm500_vm0, %v498_v25 }
 0x125   : > { %s1647_s18 = smov (!%p542_p8, %s541_s18), 32 }
 0x126   : > { %s881_s25 = sshll.u32 %s1647_s18, 7 }
 0x127   : > { %p884_p9 = scmp.eq.s32.totalorder %s881_s25, 0 }
 0x128   : > { %s1507_s26 = sshrl.u32 (!%p884_p9), %s1647_s18, 5 }
 0x129   : > { %550 = sbr.rel (%p884_p9) target bundleno = 349 (0x15d), region = 40  ;;  %p885_p10 = scmp.le.s32.totalorder (!%p884_p9), %s1507_s26, 0 }
 0x130   : > { %828 = sbr.rel (%p885_p10) target bundleno = 328 (0x148), region = 116  ;;  %s1638_s2 = smov (!%p885_p10), %s1501_s24 }
 0x131   : > { %s1639_s21 = smov (!%p885_p10), %s1400_s14  ;;  %s1516_s28 = smov (!%p885_p10), 0  }
 0x132   : > { %s1518_s27 = smov (!%p885_p10), 0  }
 0x137 LB: >> { %v674_v56 = vld [vmem:[%s1225_s21] sm:$0xff]  ;;  %v676_v26 = vld [vmem:[%s1225_s21 + $0x8] sm:$0xff]  ;;  %v678_v27 = vld [vmem:[%s1225_s21 + $0x10] sm:$0xff]  ;;  %s738_s29 = sadd.s32 1, %s1229_s28  ;;  %s668_s27 = sadd.s32 1, %s1233_s27   ;;  %s1233_s27 = sphi %s1518_s27, %s668_s27   ;;  %s1229_s28 = sphi %s1516_s28, %s1642_s28   ;;  %s1225_s21 = sphi %s1639_s21, %s1641_s21   ;;  %s1221_s2 = sphi %s1638_s2, %s1640_s2  }
 0x138   : >> { %675 = vst [vmem:[%s1221_s2] sm:$0xff] %v674_v56  ;;  %677 = vst [vmem:[%s1221_s2 + $0x8] sm:$0xff] %v676_v26  ;;  %v680_v28 = vld [vmem:[%s1225_s21 + $0x18] sm:$0xff]  ;;  %v682_v29 = vld [vmem:[%s1225_s21 + $0x20] sm:$0xff]  ;;  %p739_p11 = scmp.ge.s32.totalorder %s738_s29, %s1507_s26  ;;  %p667_p12 = scmp.ge.s32.totalorder %s668_s27, %s1507_s26 }
 0x139   : >> { %679 = vst [vmem:[%s1221_s2 + $0x10] sm:$0xff] %v678_v27  ;;  %v684_v30 = vld [vmem:[%s1225_s21 + $0x28] sm:$0xff]  ;;  %681 = vst [vmem:[%s1221_s2 + $0x18] sm:$0xff] %v680_v28  ;;  %v686_v31 = vld [vmem:[%s1225_s21 + $0x30] sm:$0xff] }
 0x13a   : >> { %683 = vst [vmem:[%s1221_s2 + $0x20] sm:$0xff] %v682_v29  ;;  %685 = vst [vmem:[%s1221_s2 + $0x28] sm:$0xff] %v684_v30  ;;  %v688_v32 = vld [vmem:[%s1225_s21 + $0x38] sm:$0xff]  ;;  %v690_v33 = vld [vmem:[%s1225_s21 + $0x40] sm:$0xff]  ;;  %s1649_s29 = smov (%p739_p11, %s738_s29), 0 }
 0x13b   : >> { %687 = vst [vmem:[%s1221_s2 + $0x30] sm:$0xff] %v686_v31  ;;  %689 = vst [vmem:[%s1221_s2 + $0x38] sm:$0xff] %v688_v32  ;;  %v692_v34 = vld [vmem:[%s1225_s21 + $0x48] sm:$0xff]  ;;  %v694_v35 = vld [vmem:[%s1225_s21 + $0x50] sm:$0xff]  ;;  %s886_s30 = sshll.u32 %s1649_s29, 8  ;;  %s1642_s28 = smov %s1649_s29 }
 0x13c   : >> { %691 = vst [vmem:[%s1221_s2 + $0x40] sm:$0xff] %v690_v33  ;;  %v696_v36 = vld [vmem:[%s1225_s21 + $0x58] sm:$0xff]  ;;  %693 = vst [vmem:[%s1221_s2 + $0x48] sm:$0xff] %v692_v34  ;;  %v698_v37 = vld [vmem:[%s1225_s21 + $0x60] sm:$0xff]  ;;  %s1574_s4 = scalar_lea.vmem %s1400_s14, %s886_s30 [#allocation3]   ;;  %s744_s5 = scalar_lea.vmem %s1501_s24, %s886_s30  }
 0x13d   : >> { %695 = vst [vmem:[%s1221_s2 + $0x50] sm:$0xff] %v694_v35  ;;  %697 = vst [vmem:[%s1221_s2 + $0x58] sm:$0xff] %v696_v36  ;;  %v700_v38 = vld [vmem:[%s1225_s21 + $0x68] sm:$0xff]  ;;  %v702_v39 = vld [vmem:[%s1225_s21 + $0x70] sm:$0xff] }
 0x13e   : >> { %699 = vst [vmem:[%s1221_s2 + $0x60] sm:$0xff] %v698_v37  ;;  %701 = vst [vmem:[%s1221_s2 + $0x68] sm:$0xff] %v700_v38  ;;  %v704_v40 = vld [vmem:[%s1225_s21 + $0x78] sm:$0xff]  ;;  %v706_v41 = vld [vmem:[%s1225_s21 + $0x80] sm:$0xff] }
 0x13f   : >> { %703 = vst [vmem:[%s1221_s2 + $0x70] sm:$0xff] %v702_v39  ;;  %v708_v42 = vld [vmem:[%s1225_s21 + $0x88] sm:$0xff]  ;;  %705 = vst [vmem:[%s1221_s2 + $0x78] sm:$0xff] %v704_v40  ;;  %v710_v43 = vld [vmem:[%s1225_s21 + $0x90] sm:$0xff] }
 0x140   : >> { %707 = vst [vmem:[%s1221_s2 + $0x80] sm:$0xff] %v706_v41  ;;  %709 = vst [vmem:[%s1221_s2 + $0x88] sm:$0xff] %v708_v42  ;;  %v712_v44 = vld [vmem:[%s1225_s21 + $0x98] sm:$0xff]  ;;  %v714_v45 = vld [vmem:[%s1225_s21 + $0xa0] sm:$0xff] }
 0x141   : >> { %711 = vst [vmem:[%s1221_s2 + $0x90] sm:$0xff] %v710_v43  ;;  %713 = vst [vmem:[%s1221_s2 + $0x98] sm:$0xff] %v712_v44  ;;  %v716_v46 = vld [vmem:[%s1225_s21 + $0xa8] sm:$0xff]  ;;  %v718_v47 = vld [vmem:[%s1225_s21 + $0xb0] sm:$0xff]  ;;  %670 = sbr.rel (!%p667_p12) target bundleno = 311 (0x137), region = 122 }
 0x142   : >> { %715 = vst [vmem:[%s1221_s2 + $0xa0] sm:$0xff] %v714_v45  ;;  %v720_v48 = vld [vmem:[%s1225_s21 + $0xb8] sm:$0xff]  ;;  %717 = vst [vmem:[%s1221_s2 + $0xa8] sm:$0xff] %v716_v46  ;;  %v722_v49 = vld [vmem:[%s1225_s21 + $0xc0] sm:$0xff] }
 0x143   : >> { %719 = vst [vmem:[%s1221_s2 + $0xb0] sm:$0xff] %v718_v47  ;;  %721 = vst [vmem:[%s1221_s2 + $0xb8] sm:$0xff] %v720_v48  ;;  %v724_v50 = vld [vmem:[%s1225_s21 + $0xc8] sm:$0xff]  ;;  %v726_v51 = vld [vmem:[%s1225_s21 + $0xd0] sm:$0xff] }
 0x144   : >> { %723 = vst [vmem:[%s1221_s2 + $0xc0] sm:$0xff] %v722_v49  ;;  %725 = vst [vmem:[%s1221_s2 + $0xc8] sm:$0xff] %v724_v50  ;;  %v728_v52 = vld [vmem:[%s1225_s21 + $0xd8] sm:$0xff]  ;;  %v730_v53 = vld [vmem:[%s1225_s21 + $0xe0] sm:$0xff] }
 0x145   : >> { %727 = vst [vmem:[%s1221_s2 + $0xd0] sm:$0xff] %v726_v51  ;;  %v732_v54 = vld [vmem:[%s1225_s21 + $0xe8] sm:$0xff]  ;;  %729 = vst [vmem:[%s1221_s2 + $0xd8] sm:$0xff] %v728_v52  ;;  %v734_v55 = vld [vmem:[%s1225_s21 + $0xf0] sm:$0xff] }
 0x146   : >> { %731 = vst [vmem:[%s1221_s2 + $0xe0] sm:$0xff] %v730_v53  ;;  %733 = vst [vmem:[%s1221_s2 + $0xe8] sm:$0xff] %v732_v54  ;;  %v736_v57 = vld [vmem:[%s1225_s21 + $0xf8] sm:$0xff]  ;;  %s1641_s21 = smov %s1574_s4 }
 0x147   : >> { %735 = vst [vmem:[%s1221_s2 + $0xf0] sm:$0xff] %v734_v55  ;;  %737 = vst [vmem:[%s1221_s2 + $0xf8] sm:$0xff] %v736_v57  ;;  %s1640_s2 = smov %s744_s5 }
 0x148 PF: > { %s1615_s6 = sand.u32 31, %s1647_s18   ;;  %s897_s7 = sshll.u32 %s1507_s26, 8 }
 0x149   : > { %s749_s8 = scalar_lea.vmem %s1400_s14, %s897_s7 [#allocation3]   ;;  %s751_s9 = scalar_lea.vmem %s1501_s24, %s897_s7  }
 0x14a   : > { %p891_p13 = scmp.le.s32.totalorder %s1615_s6, 0 }
 0x14b   : > { %s1235_s10 = smov (!%p891_p13), %s751_s9   ;;  %s1239_s11 = smov (!%p891_p13), %s749_s8  }
 0x14c   : > { %842 = sbr.rel (%p891_p13) target bundleno = 349 (0x15d), region = 127  ;;  %s1243_s12 = smov (!%p891_p13), 0  }
 0x14d   : > { %s1247_s13 = smov (!%p891_p13), 0  }
 0x153 LB: >> { %v761_v58 = vld [vmem:[%s1241_s11] sm:$0xff]  ;;  %s763_s16 = sadd.s32 1, %s1245_s12  ;;  %s755_s13 = sadd.s32 1, %s1249_s13   ;;  %s1249_s13 = sphi %s1247_s13, %s755_s13   ;;  %s1245_s12 = sphi %s1243_s12, %s1244_s12   ;;  %s1241_s11 = sphi %s1239_s11, %s768_s11   ;;  %s1237_s10 = sphi %s1235_s10, %s769_s10  }
 0x154   : >> { %762 = vst [vmem:[%s1237_s10] sm:$0xff] %v761_v58  ;;  %p764_p0 = scmp.ge.s32.totalorder %s763_s16, %s1615_s6  ;;  %p754_p1 = scmp.ge.s32.totalorder %s755_s13, %s1615_s6 }
 0x156   : >> { %s1651_s16 = smov (%p764_p0, %s763_s16), 0  ;;  %757 = sbr.rel (!%p754_p1) target bundleno = 339 (0x153), region = 133 }
 0x157   : >> { %s892_s14 = sshll.u32 %s1651_s16, 3  ;;  %s1244_s12 = smov %s1651_s16  }
 0x158   : >> { %s768_s11 = scalar_lea.vmem %s749_s8, %s892_s14 [#allocation3]   ;;  %s769_s10 = scalar_lea.vmem %s751_s9, %s892_s14  }
 0x15d PF: > { %p11_p2 = scmp.ge.s32.totalorder %s1289_s17, 4   ;;  %s1643_s14 = smov %s1213_s15 }
 0x15e   : > { %s1644_s15 = smov %s1297_s20  ;;  %s1645_s16 = smov %s1289_s17 }
 0x15f   :  { %13 = sbr.rel (!%p11_p2) target bundleno = 4 (0x4), region = 144 }

</bundles_post_ra>
